<compile_context>
chip_gen: v7x
topology: tpu7x:2x2x1
jax: 0.10.0
libtpu: 0.0.40
codegen_flags: <defaults>
</compile_context>

<pallas_src>
import functools
import math

import jax
import jax.numpy as jnp
from jax.experimental import pallas as pl
from jax.experimental.pallas import tpu as pltpu


def _vmem_budgets():
    """(vmem_limit_bytes, per-block double-buffered budget) per TPU generation."""
    try:
        cap = pltpu.get_tpu_info().vmem_capacity_bytes
    except Exception:  # query unavailable — be conservative
        cap = 0
    if cap >= (100 << 20):            # v5e / v6e: 128 MiB physical VMEM
        return 64 << 20, 32 << 20
    return 32 << 20, 16 << 20         # v7x (64 MiB) or unknown


def _sublane_multiple(*dtypes):
    """Native sublane tile for the narrowest stream dtype: 8/16/32 rows."""
    m = 8
    for dt in dtypes:
        m = max(m, 32 // max(jnp.dtype(dt).itemsize, 1))
    return m


def _pick_lane_width(total):
    """Largest 128-multiple lane width that divides the element count."""
    for lane in (2048, 1024, 512, 256, 128):
        if total % lane == 0:
            return lane
    return None


def _budget_rows(lane, itemsizes, block_budget):
    """Max block rows so all double-buffered streams fit the VMEM budget."""
    bytes_per_row = 2 * lane * sum(itemsizes)   # x2: double-buffered pipeline
    return max(block_budget // max(bytes_per_row, 1), 1)


def _pick_block_rows(rows, mult, max_rows, want_two_blocks=True):
    """Row-block size: multiple of `mult`, within the VMEM budget, preferring
    an exact divisor of `rows` and >= 2 grid steps (v7x megacore)."""
    if rows <= mult:
        return rows                               # single full-height block
    cap = max(mult, min(max_rows, rows))
    if want_two_blocks:
        half = -(-rows // 2)                      # cdiv(rows, 2)
        half = -(-half // mult) * mult            # round up to sublane tile
        cap = min(cap, half)
    cap = max(mult, (cap // mult) * mult)
    for tm in range(cap, mult - 1, -mult):        # prefer an exact divisor
        if rows % tm == 0:
            return tm
    return cap                                    # ragged last block (handled)


def _focal_elems(x, t, alpha, gamma):
    """Per-element focal loss in f32 (numerically stable BCE with logits).

    Shares e = exp(-|x|) between log1p and sigmoid; the sigmoid denominator
    uses the approximate EUP reciprocal; small integer gamma avoids float pow.
    """
    e = jnp.exp(-jnp.abs(x))                              # EUP: exp
    # BCEWithLogitsLoss(reduction='none'): max(x,0) - x*t + log(1 + exp(-|x|))
    bce = jnp.maximum(x, 0.0) - x * t + jnp.log1p(e)      # EUP: log
    inv_1pe = pl.reciprocal(1.0 + e, approx=True)         # EUP: vrcp (approx)
    sig = jnp.where(x >= 0.0, inv_1pe, e * inv_1pe)       # == sigmoid(x)
    # Matches the PyTorch module exactly: where(targets == 1, sig, 1 - sig).
    pt = jnp.where(t == 1.0, sig, 1.0 - sig)
    omp = 1.0 - pt
    if gamma == 0.0:
        mod = jnp.ones_like(omp)
    elif gamma == 1.0:
        mod = omp
    elif gamma == 2.0:
        mod = omp * omp
    else:
        mod = omp ** gamma
    out = mod * bce
    if alpha != 1.0:
        out = alpha * out
    return out


def _focal_none_kernel(x_ref, t_ref, o_ref, *, alpha, gamma):
    """Per-element focal loss (reduction='none'), one row-block per grid step."""
    f = _focal_elems(
        x_ref[...].astype(jnp.float32),
        t_ref[...].astype(jnp.float32),
        alpha, gamma,
    )
    o_ref[...] = f.astype(o_ref.dtype)


def _focal_partial_kernel(x_ref, t_ref, p_ref, *, gamma, block_rows, valid_rows):
    """One lane-dense f32 partial row per block; alpha applied outside."""
    f = _focal_elems(
        x_ref[...].astype(jnp.float32),
        t_ref[...].astype(jnp.float32),
        1.0, gamma,
    )
    if valid_rows is not None:            # ragged last block: mask padded rows
        row0 = pl.program_id(0) * block_rows
        row_id = row0 + jax.lax.broadcasted_iota(jnp.int32, f.shape, 0)
        f = jnp.where(row_id < valid_rows, f, 0.0)
    # Rows reduced in-kernel; the (1, 1, L) lane-dense store stays unmasked.
    p_ref[...] = jnp.sum(f, axis=0, keepdims=True)[None]


def focal_loss(inputs, targets, *, alpha=1.0, gamma=2.0, reduction="mean"):
    """Pallas TPU implementation of FocalLoss.forward (arbitrary input shape)."""
    assert inputs.shape == targets.shape, "inputs/targets must match"
    if reduction not in ("none", "mean", "sum"):
        raise ValueError(f"unknown reduction: {reduction}")

    orig_shape = inputs.shape
    total = math.prod(orig_shape) if orig_shape else 1
    assert total > 0, "empty input"

    # Lane-dense 2-D view: (rows, lane) with lane a multiple of 128 if possible.
    lane = _pick_lane_width(total)
    if lane is None:
        lane = orig_shape[-1] if orig_shape else 1
    rows = total // lane
    x2 = inputs.reshape(rows, lane)
    t2 = targets.reshape(rows, lane)

    vmem_limit, block_budget = _vmem_budgets()
    compiler_params = pltpu.CompilerParams(
        dimension_semantics=("parallel",),
        vmem_limit_bytes=vmem_limit,
    )
    mult = _sublane_multiple(inputs.dtype, targets.dtype)

    if reduction == "none":
        itemsizes = (inputs.dtype.itemsize, targets.dtype.itemsize,
                     inputs.dtype.itemsize)           # in, tgt, out streams
        tm = _pick_block_rows(rows, mult,
                              _budget_rows(lane, itemsizes, block_budget))
        out2 = pl.pallas_call(
            functools.partial(_focal_none_kernel, alpha=alpha, gamma=gamma),
            out_shape=jax.ShapeDtypeStruct((rows, lane), inputs.dtype),
            grid_spec=pltpu.PrefetchScalarGridSpec(
                num_scalar_prefetch=0,
                grid=(pl.cdiv(rows, tm),),
                in_specs=[pl.BlockSpec((tm, lane), lambda i: (i, 0)),
                          pl.BlockSpec((tm, lane), lambda i: (i, 0))],
                out_specs=pl.BlockSpec((tm, lane), lambda i: (i, 0)),
            ),
            compiler_params=compiler_params,
        )(x2, t2)
        return out2.reshape(orig_shape)

    itemsizes = (inputs.dtype.itemsize, targets.dtype.itemsize)
    tm = _pick_block_rows(rows, mult,
                          _budget_rows(lane, itemsizes, block_budget))
    num_blocks = pl.cdiv(rows, tm)
    valid_rows = rows if rows % tm != 0 else None     # static ragged flag

    partials = pl.pallas_call(
        functools.partial(_focal_partial_kernel, gamma=gamma,
                          block_rows=tm, valid_rows=valid_rows),
        out_shape=jax.ShapeDtypeStruct((num_blocks, 1, lane), jnp.float32),
        grid_spec=pltpu.PrefetchScalarGridSpec(
            num_scalar_prefetch=0,
            grid=(num_blocks,),
            in_specs=[pl.BlockSpec((tm, lane), lambda i: (i, 0)),
                      pl.BlockSpec((tm, lane), lambda i: (i, 0))],
            out_specs=pl.BlockSpec((1, 1, lane), lambda i: (i, 0, 0)),
        ),
        compiler_params=compiler_params,
    )(x2, t2)

    total_sum = jnp.sum(partials, dtype=jnp.float32) * jnp.float32(alpha)
    if reduction == "mean":
        total_sum = total_sum / jnp.float32(total)
    # Parity with PyTorch: result dtype follows the inputs (f32 in practice).
    return total_sum.astype(inputs.dtype)


def _reference(inputs, targets, alpha=1.0, gamma=2.0, reduction="mean"):
    """Straightforward JAX port of the PyTorch module, for validation."""
    x = inputs.astype(jnp.float32)
    t = targets.astype(jnp.float32)
    bce = jnp.maximum(x, 0.0) - x * t + jnp.log1p(jnp.exp(-jnp.abs(x)))
    sig = jax.nn.sigmoid(x)
    pt = jnp.where(t == 1.0, sig, 1.0 - sig)
    f = alpha * (1.0 - pt) ** gamma * bce
    if reduction == "mean":
        return f.mean()
    if reduction == "sum":
        return f.sum()
    return f.astype(inputs.dtype)


if __name__ == "__main__":
    # Tolerances are loosened because the kernel uses the approximate EUP
    # reciprocal inside the sigmoid (perf-review recommendation for v5e).
    RTOL, ATOL = 2e-2, 2e-3

    key = jax.random.PRNGKey(0)
    k1, k2, k3, k4, k5, k6 = jax.random.split(key, 6)

    # Small multi-label head: batch=8, num_classes=32 (flattens lane-dense).
    x1 = jax.random.normal(k1, (8, 32), dtype=jnp.float32) * 2.0
    t1 = jax.random.bernoulli(k2, 0.3, (8, 32)).astype(jnp.float32)
    for red in ("mean", "sum", "none"):
        got = jax.block_until_ready(
            focal_loss(x1, t1, alpha=1.0, gamma=2.0, reduction=red))
        ref = _reference(x1, t1, 1.0, 2.0, red)
        assert jnp.allclose(got, ref, rtol=RTOL, atol=ATOL), (red, got, ref)

    # Multi-block parallel grid (>= 2 blocks so both v7x TensorCores get work).
    x2 = jax.random.normal(k3, (256, 256), dtype=jnp.float32)
    t2 = jax.random.bernoulli(k4, 0.5, (256, 256)).astype(jnp.float32)
    got2 = jax.block_until_ready(
        focal_loss(x2, t2, alpha=0.25, gamma=2.0, reduction="mean"))
    ref2 = _reference(x2, t2, 0.25, 2.0, "mean")
    assert jnp.allclose(got2, ref2, rtol=RTOL, atol=ATOL), (got2, ref2)

    # Ragged row count (13 rows of 128 lanes) exercises the in-kernel masking
    # for the reduce path and clipped edge-block writes for 'none'.
    x3 = jax.random.normal(k5, (13, 128), dtype=jnp.float32)
    t3 = jax.random.bernoulli(k6, 0.4, (13, 128)).astype(jnp.float32)
    got3 = jax.block_until_ready(focal_loss(x3, t3, reduction="sum"))
    ref3 = _reference(x3, t3, 1.0, 2.0, "sum")
    assert jnp.allclose(got3, ref3, rtol=RTOL, atol=1e-1), (got3, ref3)
    got3n = jax.block_until_ready(focal_loss(x3, t3, reduction="none"))
    ref3n = _reference(x3, t3, 1.0, 2.0, "none")
    assert jnp.allclose(got3n, ref3n, rtol=RTOL, atol=ATOL), "none ragged mismatch"

    # Narrow, non-128-multiple trailing dim (fallback full-width layout path).
    x4 = jax.random.normal(k1, (8, 50), dtype=jnp.float32)
    t4 = jax.random.bernoulli(k2, 0.5, (8, 50)).astype(jnp.float32)
    got4 = jax.block_until_ready(
        focal_loss(x4, t4, gamma=1.0, reduction="mean"))
    ref4 = _reference(x4, t4, 1.0, 1.0, "mean")
    assert jnp.allclose(got4, ref4, rtol=RTOL, atol=ATOL), (got4, ref4)

    print("KERNEL_OK")
</pallas_src>

<mosaic_0001>
module attributes {stable_mosaic.version = 11 : i64} {
  func.func @_focal_partial_kernel(%arg0: i32, %arg1: memref<1x256xf32, #tpu.memory_space<vmem>>, %arg2: memref<1x256xf32, #tpu.memory_space<vmem>>, %arg3: memref<1x1x256xf32, #tpu.memory_space<vmem>>) attributes {dimension_semantics = [#tpu.dimension_semantics<parallel>], iteration_bounds = array<i64: 1>, scalar_prefetch = 0 : i64, scratch_operands = 0 : i64, tpu.core_type = #tpu.core_type<tc>, window_params = [{transform_indices = @transform_0, window_bounds = array<i64: 1, 256>}, {transform_indices = @transform_1, window_bounds = array<i64: 1, 256>}, {transform_indices = @transform_2, window_bounds = array<i64: 1, 1, 256>}]} {
    %c0 = arith.constant 0 : index
    %c0_0 = arith.constant 0 : index
    %0 = vector.load %arg1[%c0, %c0_0] : memref<1x256xf32, #tpu.memory_space<vmem>>, vector<1x256xf32>
    %c0_1 = arith.constant 0 : index
    %c0_2 = arith.constant 0 : index
    %1 = vector.load %arg2[%c0_1, %c0_2] : memref<1x256xf32, #tpu.memory_space<vmem>>, vector<1x256xf32>
    %2 = math.absf %0 : vector<1x256xf32>
    %cst = arith.constant 0.000000e+00 : f32
    %3 = vector.broadcast %cst : f32 to vector<1x256xf32>
    %4 = arith.subf %3, %2 : vector<1x256xf32>
    %5 = math.exp %4 : vector<1x256xf32>
    %cst_3 = arith.constant 0.000000e+00 : f32
    %6 = vector.broadcast %cst_3 : f32 to vector<1x256xf32>
    %7 = arith.maximumf %0, %6 : vector<1x256xf32>
    %8 = arith.mulf %0, %1 : vector<1x256xf32>
    %9 = arith.subf %7, %8 : vector<1x256xf32>
    %10 = math.log1p %5 : vector<1x256xf32>
    %11 = arith.addf %9, %10 : vector<1x256xf32>
    %cst_4 = arith.constant 1.000000e+00 : f32
    %12 = vector.broadcast %cst_4 : f32 to vector<1x256xf32>
    %13 = arith.addf %12, %5 : vector<1x256xf32>
    %14 = tpu.reciprocal %13 {approx = true} : vector<1x256xf32> -> vector<1x256xf32>
    %cst_5 = arith.constant 0.000000e+00 : f32
    %15 = vector.broadcast %cst_5 : f32 to vector<1x256xf32>
    %16 = arith.cmpf oge, %0, %15 : vector<1x256xf32>
    %17 = arith.mulf %5, %14 : vector<1x256xf32>
    %18 = arith.select %16, %14, %17 : vector<1x256xi1>, vector<1x256xf32>
    %cst_6 = arith.constant 1.000000e+00 : f32
    %19 = vector.broadcast %cst_6 : f32 to vector<1x256xf32>
    %20 = arith.cmpf oeq, %1, %19 : vector<1x256xf32>
    %cst_7 = arith.constant 1.000000e+00 : f32
    %21 = vector.broadcast %cst_7 : f32 to vector<1x256xf32>
    %22 = arith.subf %21, %18 : vector<1x256xf32>
    %23 = arith.select %20, %18, %22 : vector<1x256xi1>, vector<1x256xf32>
    %cst_8 = arith.constant 1.000000e+00 : f32
    %24 = vector.broadcast %cst_8 : f32 to vector<1x256xf32>
    %25 = arith.subf %24, %23 : vector<1x256xf32>
    %26 = arith.mulf %25, %25 : vector<1x256xf32>
    %27 = arith.mulf %26, %11 : vector<1x256xf32>
    %cst_9 = arith.constant dense<0.000000e+00> : vector<256xf32>
    %28 = vector.multi_reduction <add>, %27, %cst_9 [0] : vector<1x256xf32> to vector<256xf32>
    %29 = vector.shape_cast %28 : vector<256xf32> to vector<1x256xf32>
    %30 = vector.shape_cast %29 : vector<1x256xf32> to vector<1x1x256xf32>
    %c0_10 = arith.constant 0 : index
    %c0_11 = arith.constant 0 : index
    %c0_12 = arith.constant 0 : index
    %31 = vector.load %arg3[%c0_10, %c0_11, %c0_12] : memref<1x1x256xf32, #tpu.memory_space<vmem>>, vector<1x1x256xf32>
    tpu.vector_store %arg3[%c0_10, %c0_11, %c0_12], %30 {strides = array<i32>} : memref<1x1x256xf32, #tpu.memory_space<vmem>>, vector<1x1x256xf32>,
    return
  }
  func.func @transform_0(%arg0: i32) -> (i32, i32) {
    %c0_i32 = arith.constant 0 : i32
    %c0_i32_0 = arith.constant 0 : i32
    return %arg0, %c0_i32 : i32, i32
  }
  func.func @transform_1(%arg0: i32) -> (i32, i32) {
    %c0_i32 = arith.constant 0 : i32
    %c0_i32_0 = arith.constant 0 : i32
    return %arg0, %c0_i32 : i32, i32
  }
  func.func @transform_2(%arg0: i32) -> (i32, i32, i32) {
    %c0_i32 = arith.constant 0 : i32
    %c0_i32_0 = arith.constant 0 : i32
    %c0_i32_1 = arith.constant 0 : i32
    return %arg0, %c0_i32, %c0_i32_0 : i32, i32, i32
  }
}

</mosaic_0001>

<bundles_post_ra>
// kernel: tpu_custom_call.1
= control target key start
LH: loop header
LB: loop body
LE: loop exit
PB: predicated region body
PF: predicated region fallthrough
CT: control target
= control target key end

     0   :  { %7 = vsyncpa [#allocation3], 0  ;;  %s175_s0 = inlined_call_operand.hbm [shape: f32[1,256], index: 0, kind: input, shape index: {}]   ;;  %s176_s1 = inlined_call_operand.vmem [shape: f32[1,256], index: 1, kind: input, shape index: {}]   ;;  %s177_s2 = inlined_call_operand.hbm [shape: f32[1,1,256], index: 2, kind: output, shape index: {}]  }
   0x1   :  { %8 = vsyncpa [#allocation4], 0  ;;  %s131_s9 = smov [#allocation2]   ;;  %s83_s13 = scalar_lea.hbm %s175_s0, 32 }
   0x2   :  { %s15_s10 = sshll.u32 %s131_s9, 4  ;;  %p84_p0 = scmp.ne.s32.totalorder %s175_s0, %s83_s13  ;;  %s16_s10 = int_to_ptr.vmem [resolvable:$true] %s15_s10 }
   0x3   :  { %p87_p1 = scmp.lt.u32.totalorder %s83_s13, %s175_s0 }
   0x5   :  { %p89_p2 = pnand %p87_p1, %p84_p0 }
   0x7   :  { %92 = shalt.err (!%p89_p2)
}
   0x8   :  { %s93_s18 = scalar_lea.vmem %s16_s10, 32  ;;  %p98_p4 = scmp.lt.s32.totalorder %s16_s10, %s16_s10 }
   0x9   :  { %p94_p3 = scmp.ne.s32.totalorder %s16_s10, %s93_s18  ;;  %p99_p5 = scmp.lt.s32.totalorder %s93_s18, %s93_s18 }
   0xb   :  { %p100_p6 = por %p99_p5, %p98_p4 }
   0xd   :  { %p101_p7 = pnand %p100_p6, %p94_p3 }
   0xf   :  { %104 = shalt.err (!%p101_p7)
}
  0x10   :  { %18 = dma.hbm_to_vmem [thread:$0]  %s175_s0, 32, %s16_s10, [#allocation3]  }
  0x11   :  { %127 = dma.done.wait [#allocation3], 32  }
  0x12   :  { %128 = vsyncadd [#allocation3], 4294967264  ;;  %v24_v0 = vld [vmem:[#allocation2] sm:$0x3]  ;;  %v55_v22 = vlaneseq  ;;  %s132_s0 = smov [#allocation5]  }
  0x13   :  { %v26_v1 = vand.u32 2147483647, %v24_v0  ;;  %v25_v7 = vld [vmem:[%s176_s1] sm:$0x3]  ;;  %v30_v11 = vmax.f32 %v24_v0, 0.0  ;;  %vm45_vm0 = vcmp.ge.f32.partialorder %v24_v0, 0.0 }
  0x14   :  { %v31_v12 = vmul.f32 %v25_v7, %v24_v0  ;;  %vm48_vm2 = vcmp.eq.f32.partialorder %v25_v7, 1.0  ;;  %s66_s1 = sshll.u32 %s132_s0, 4  ;;  %vm57_vm3 = vcmp.lt.s32.totalorder %v55_v22, 256  ;;  %s67_s1 = int_to_ptr.vmem [resolvable:$true] %s66_s1 }
  0x15   :  { %v27_v2 = vsub.f32 0.0, %v26_v1  ;;  %s105_s23 = scalar_lea.vmem %s67_s1, 32  ;;  %p110_p9 = scmp.lt.s32.totalorder %s67_s1, %s67_s1 }
  0x16   :  { %v32_v17 = vsub.f32 %v30_v11, %v31_v12  ;;  %p106_p8 = scmp.ne.s32.totalorder %s67_s1, %s105_s23  ;;  %p111_p10 = scmp.lt.s32.totalorder %s105_s23, %s105_s23 }
  0x17   :  { %v28_v3 = vmul.f32 1.442695, %v27_v2 }
  0x18   :  { %p112_p11 = por %p111_p10, %p110_p9 }
  0x19   :  { %77 = vpow2.f32 %v28_v3 }
  0x1a   :  { %p113_p12 = pnand %p112_p11, %p106_p8 }
  0x23   :  { %v78_v4 = vpop.eup %77 }
  0x24   :  { %v33_v5 = vadd.f32 1.0, %v78_v4  ;;  %v36_v6 = vmul.f32 -0.5, %v78_v4  ;;  %v39_v9 = vand.u32 2147483647, %v78_v4 }
  0x26   :  { %79 = vlog2.f32 %v33_v5  ;;  %v37_v8 = vadd.f32 1.0, %v36_v6  ;;  %vm40_vm1 = vcmp.lt.f32.partialorder %v39_v9, 0.0004427343 }
  0x27   :  { %81 = vrcp.f32 %v33_v5 }
  0x28   :  { %v38_v15 = vmul.f32 %v78_v4, %v37_v8 }
  0x30   :  { %v80_v10 = vpop.eup %79 }
  0x31   :  { %v82_v13 = vpop.eup %81  ;;  %v35_v14 = vmul.f32 0.6931472, %v80_v10 }
  0x32   :  { %v46_v16 = vmul.f32 %v82_v13, %v78_v4 }
  0x33   :  { %v41_v19 = vsel %vm40_vm1, %v38_v15, %v35_v14 }
  0x34   :  { %v47_v18 = vsel %vm45_vm0, %v82_v13, %v46_v16  ;;  %v42_v23 = vadd.f32 %v41_v19, %v32_v17 }
  0x35   :  { %v49_v20 = vsub.f32 1.0, %v47_v18 }
  0x37   :  { %v50_v21 = vsel %vm48_vm2, %v47_v18, %v49_v20 }
  0x38   :  { %v51_v24 = vsub.f32 1.0, %v50_v21 }
  0x3a   :  { %v52_v25 = vmul.f32 %v51_v24, %v51_v24 }
  0x3c   :  { %v53_v26 = vmul.f32 %v52_v25, %v42_v23 }
  0x3e   :  { %59 = vst.msk [vmem:[#allocation5] sm:$0x3] %vm57_vm3, %v53_v26 }
  0x3f   :  { %116 = shalt.err (!%p113_p12)
}
  0x40   :  { %s117_s26 = scalar_lea.hbm %s177_s2, 32 }
  0x41   :  { %p118_p13 = scmp.ne.s32.totalorder %s177_s2, %s117_s26  ;;  %p121_p0 = scmp.lt.u32.totalorder %s117_s26, %s177_s2 }
  0x43   :  { %p123_p1 = pnand %p121_p0, %p118_p13 }
  0x45   :  { %126 = shalt.err (!%p123_p1)
}
  0x46   :  { %69 = dma.vmem_to_hbm [thread:$0]  %s67_s1, 32, %s177_s2, [#allocation4]  }
  0x47   :  { %129 = dma.done.wait [#allocation4], 32  }
  0x48   :  { %130 = vsyncadd [#allocation4], 4294967264 }
  0x49   :  { %73 = vsyncpa [#allocation3], 1 }
  0x4a   :  { %74 = vsyncpa [#allocation4], 1 }

</bundles_post_ra>
